<compile_context>
chip_gen: v5e
topology: v5e:2x2
jax: 0.10.0
libtpu: 0.0.40
codegen_flags: <defaults>
</compile_context>

<pallas_src>
import math
from functools import partial

import jax
import jax.numpy as jnp
from jax import lax
from jax.experimental import pallas as pl
from jax.experimental.pallas import tpu as pltpu

_LN_EPS = 1e-5
_NEG_INF = -1e30

_PARALLEL_1D = pltpu.CompilerParams(dimension_semantics=("parallel",))


# ----------------------------------------------------------------------------
# small in-kernel helpers (VPU/EUP friendly: exp / mul / add only)
# ----------------------------------------------------------------------------
def _erf(x):
    # Abramowitz & Stegun 7.1.26, max abs err ~1.5e-7 (exact GELU to f32 noise).
    a1, a2, a3, a4, a5 = 0.254829592, -0.284496736, 1.421413741, -1.453152027, 1.061405429
    sign = jnp.where(x < 0.0, -1.0, 1.0)
    ax = jnp.abs(x)
    t = 1.0 / (1.0 + 0.3275911 * ax)
    poly = t * (a1 + t * (a2 + t * (a3 + t * (a4 + t * a5))))
    return sign * (1.0 - poly * jnp.exp(-ax * ax))


def _gelu_exact(x):
    # PyTorch nn.GELU() default is the exact (erf) formulation.
    return 0.5 * x * (1.0 + _erf(x * 0.7071067811865476))


def _linear_t(x, w_ref, b_ref):
    """x @ W^T + b with W stored PyTorch-style (out_features, in_features)."""
    w = w_ref[...].astype(jnp.float32)
    y = lax.dot_general(x, w, (((1,), (1,)), ((), ())),
                        preferred_element_type=jnp.float32)
    return y + b_ref[...].astype(jnp.float32)


def _layernorm_f32(x, g_ref, b_ref):
    mean = jnp.mean(x, axis=-1, keepdims=True)
    xc = x - mean
    var = jnp.mean(xc * xc, axis=-1, keepdims=True)
    return (xc * lax.rsqrt(var + _LN_EPS) * g_ref[...].astype(jnp.float32)
            + b_ref[...].astype(jnp.float32))


# ----------------------------------------------------------------------------
# Pallas kernels
# ----------------------------------------------------------------------------
def _layernorm_kernel(x_ref, g_ref, b_ref, o_ref):
    x = x_ref[...].astype(jnp.float32)
    o_ref[...] = _layernorm_f32(x, g_ref, b_ref).astype(o_ref.dtype)


def _mha_kernel(x_ref, c_ref, wq_ref, wk_ref, wv_ref, bq_ref, bk_ref, bv_ref,
                wo_ref, bo_ref, mask_ref, o_ref, *, num_heads):
    """nn.MultiheadAttention(q=x, k=c, v=c, attn_mask=local) for one batch elem."""
    x = x_ref[0].astype(jnp.float32)       # (Lq, D)
    ctx = c_ref[0].astype(jnp.float32)     # (Lk, D)
    d = x.shape[-1]
    hd = d // num_heads
    scale = 1.0 / math.sqrt(hd)            # PyTorch scales q by head_dim**-0.5

    q = _linear_t(x, wq_ref, bq_ref) * scale   # (Lq, D)
    k = _linear_t(ctx, wk_ref, bk_ref)         # (Lk, D)
    v = _linear_t(ctx, wv_ref, bv_ref)         # (Lk, D)
    mask = mask_ref[...]                       # (Lq, Lk) additive (0 / -1e30)

    # Per-head loop with 2-D ops only (no 3-D transposes in Mosaic).
    head_outs = []
    for h in range(num_heads):
        lo = h * hd
        qh = q[:, lo:lo + hd]                  # (Lq, hd)
        kh = k[:, lo:lo + hd]                  # (Lk, hd)
        vh = v[:, lo:lo + hd]                  # (Lk, hd)
        s = lax.dot_general(qh, kh, (((1,), (1,)), ((), ())),
                            preferred_element_type=jnp.float32) + mask
        s = s - jnp.max(s, axis=-1, keepdims=True)
        e = jnp.exp(s)
        p = e / jnp.sum(e, axis=-1, keepdims=True)
        head_outs.append(
            lax.dot_general(p, vh, (((1,), (0,)), ((), ())),
                            preferred_element_type=jnp.float32))
    attn = jnp.concatenate(head_outs, axis=-1)  # (Lq, D), heads contiguous

    o_ref[0] = _linear_t(attn, wo_ref, bo_ref).astype(o_ref.dtype)


def _concat_proj_kernel(x_ref, s_ref, w1_ref, w2_ref, b_ref, o_ref):
    # cross_proj(concat([x, s], -1)) == x @ W[:, :D]^T + s @ W[:, D:]^T + b
    x = x_ref[...].astype(jnp.float32)
    s = s_ref[...].astype(jnp.float32)
    y = lax.dot_general(x, w1_ref[...].astype(jnp.float32),
                        (((1,), (1,)), ((), ())), preferred_element_type=jnp.float32)
    y = y + lax.dot_general(s, w2_ref[...].astype(jnp.float32),
                            (((1,), (1,)), ((), ())), preferred_element_type=jnp.float32)
    o_ref[...] = (y + b_ref[...].astype(jnp.float32)).astype(o_ref.dtype)


def _ln_mlp_residual_kernel(x_ref, g_ref, bt_ref, w1_ref, b1_ref, w2_ref, b2_ref, o_ref):
    # x = channel_norm(x); x = (Linear -> GELU -> Linear)(x) + x
    x = x_ref[...].astype(jnp.float32)
    xn = _layernorm_f32(x, g_ref, bt_ref)
    h = _gelu_exact(_linear_t(xn, w1_ref, b1_ref))
    y = _linear_t(h, w2_ref, b2_ref) + xn
    o_ref[...] = y.astype(o_ref.dtype)


# ----------------------------------------------------------------------------
# pallas_call wrappers
# ----------------------------------------------------------------------------
def _row_tile(rows, max_tile=512):
    t = max_tile
    while t >= 8:
        if rows % t == 0:
            return t
        t //= 2
    return rows  # falls back to the full extent (legal block)


def layernorm_rows(x2d, gamma, beta):
    r, d = x2d.shape
    tm = _row_tile(r)
    return pl.pallas_call(
        _layernorm_kernel,
        out_shape=jax.ShapeDtypeStruct((r, d), x2d.dtype),
        grid=(r // tm,),
        in_specs=[pl.BlockSpec((tm, d), lambda i: (i, 0)),
                  pl.BlockSpec((1, d), lambda i: (0, 0)),
                  pl.BlockSpec((1, d), lambda i: (0, 0))],
        out_specs=pl.BlockSpec((tm, d), lambda i: (i, 0)),
        compiler_params=_PARALLEL_1D,
    )(x2d, gamma.reshape(1, d), beta.reshape(1, d))


def multihead_cross_attention(xq, c, wq, wk, wv, bq, bk, bv, wo, bo,
                              mask_add, num_heads):
    b, lq, d = xq.shape
    lk = c.shape[1]
    wspec = pl.BlockSpec((d, d), lambda i: (0, 0))
    bspec = pl.BlockSpec((1, d), lambda i: (0, 0))
    return pl.pallas_call(
        partial(_mha_kernel, num_heads=num_heads),
        out_shape=jax.ShapeDtypeStruct((b, lq, d), xq.dtype),
        grid=(b,),
        in_specs=[pl.BlockSpec((1, lq, d), lambda i: (i, 0, 0)),
                  pl.BlockSpec((1, lk, d), lambda i: (i, 0, 0)),
                  wspec, wspec, wspec, bspec, bspec, bspec,
                  wspec, bspec,
                  pl.BlockSpec((lq, lk), lambda i: (0, 0))],
        out_specs=pl.BlockSpec((1, lq, d), lambda i: (i, 0, 0)),
        compiler_params=_PARALLEL_1D,
    )(xq, c, wq, wk, wv,
      bq.reshape(1, d), bk.reshape(1, d), bv.reshape(1, d),
      wo, bo.reshape(1, d), mask_add)


def concat_linear(x2d, s2d, w, b):
    r, d = x2d.shape
    tm = _row_tile(r)
    w1, w2 = w[:, :d], w[:, d:]
    return pl.pallas_call(
        _concat_proj_kernel,
        out_shape=jax.ShapeDtypeStruct((r, d), x2d.dtype),
        grid=(r // tm,),
        in_specs=[pl.BlockSpec((tm, d), lambda i: (i, 0)),
                  pl.BlockSpec((tm, d), lambda i: (i, 0)),
                  pl.BlockSpec((d, d), lambda i: (0, 0)),
                  pl.BlockSpec((d, d), lambda i: (0, 0)),
                  pl.BlockSpec((1, d), lambda i: (0, 0))],
        out_specs=pl.BlockSpec((tm, d), lambda i: (i, 0)),
        compiler_params=_PARALLEL_1D,
    )(x2d, s2d, w1, w2, b.reshape(1, d))


def ln_mlp_residual(x2d, gamma, beta, w1, b1, w2, b2):
    r, d = x2d.shape
    tm = _row_tile(r)
    return pl.pallas_call(
        _ln_mlp_residual_kernel,
        out_shape=jax.ShapeDtypeStruct((r, d), x2d.dtype),
        grid=(r // tm,),
        in_specs=[pl.BlockSpec((tm, d), lambda i: (i, 0)),
                  pl.BlockSpec((1, d), lambda i: (0, 0)),
                  pl.BlockSpec((1, d), lambda i: (0, 0)),
                  pl.BlockSpec((d, d), lambda i: (0, 0)),
                  pl.BlockSpec((1, d), lambda i: (0, 0)),
                  pl.BlockSpec((d, d), lambda i: (0, 0)),
                  pl.BlockSpec((1, d), lambda i: (0, 0))],
        out_specs=pl.BlockSpec((tm, d), lambda i: (i, 0)),
        compiler_params=_PARALLEL_1D,
    )(x2d, gamma.reshape(1, d), beta.reshape(1, d),
      w1, b1.reshape(1, d), w2, b2.reshape(1, d))


# ----------------------------------------------------------------------------
# MambaMixer forward (host-side glue: only free reshapes + tiny param slices)
# ----------------------------------------------------------------------------
def local_attention_mask_additive(num_q, num_k):
    """Attention.get_local_mask as an additive f32 mask (0 allowed, -1e30 masked)."""
    keys_per_query = num_k // num_q
    extra = num_k % num_q
    rows, start = [], 0
    for i in range(num_q):
        cnt = keys_per_query + (1 if i < extra else 0)
        rows.append([0.0 if start <= j < start + cnt else _NEG_INF
                     for j in range(num_k)])
        start += cnt
    return jnp.asarray(rows, dtype=jnp.float32)


def mamba_mixer_block_forward(x, c, p, mask_add, num_heads):
    b, lq, d = x.shape
    xn2d = layernorm_rows(x.reshape(b * lq, d), p["seq_gamma"], p["seq_beta"])
    xn = xn2d.reshape(b, lq, d)
    # TODO(synk): the default 'mamba' sequence mixer (mamba_ssm selective scan) is an
    # external dependency not defined in the spec; with sequence_mix_type='self-attention'
    # the spec's forward applies no sequence mixing here (if/elif only covers 'mamba'/'attention').
    score = multihead_cross_attention(
        xn, c,
        p["attn_in_w"][:d], p["attn_in_w"][d:2 * d], p["attn_in_w"][2 * d:],
        p["attn_in_b"][:d], p["attn_in_b"][d:2 * d], p["attn_in_b"][2 * d:],
        p["attn_out_w"], p["attn_out_b"], mask_add, num_heads)
    x2d = concat_linear(xn2d, score.reshape(b * lq, d), p["cross_w"], p["cross_b"])
    y2d = ln_mlp_residual(x2d, p["chan_gamma"], p["chan_beta"],
                          p["mlp_w1"], p["mlp_b1"], p["mlp_w2"], p["mlp_b2"])
    return y2d.reshape(b, lq, d)


def mamba_mixer_forward(x, c, blocks_params, num_heads):
    mask_add = local_attention_mask_additive(x.shape[1], c.shape[1])
    for p in blocks_params:
        x = mamba_mixer_block_forward(x, c, p, mask_add, num_heads)
    return x


# ----------------------------------------------------------------------------
# pure-JAX reference (mirrors the PyTorch module)
# ----------------------------------------------------------------------------
def _ln_ref(x, g, b):
    mean = jnp.mean(x, -1, keepdims=True)
    var = jnp.mean((x - mean) ** 2, -1, keepdims=True)
    return (x - mean) / jnp.sqrt(var + _LN_EPS) * g + b


def _mha_ref(xq, c, p, mask_add, num_heads):
    bsz, lq, d = xq.shape
    lk = c.shape[1]
    hd = d // num_heads
    wq, wk, wv = p["attn_in_w"][:d], p["attn_in_w"][d:2 * d], p["attn_in_w"][2 * d:]
    bq, bk, bv = p["attn_in_b"][:d], p["attn_in_b"][d:2 * d], p["attn_in_b"][2 * d:]
    q = (xq @ wq.T + bq).reshape(bsz, lq, num_heads, hd).transpose(0, 2, 1, 3)
    k = (c @ wk.T + bk).reshape(bsz, lk, num_heads, hd).transpose(0, 2, 1, 3)
    v = (c @ wv.T + bv).reshape(bsz, lk, num_heads, hd).transpose(0, 2, 1, 3)
    s = jnp.einsum("bhqd,bhkd->bhqk", q / math.sqrt(hd), k) + mask_add
    a = jax.nn.softmax(s, axis=-1)
    o = jnp.einsum("bhqk,bhkd->bhqd", a, v).transpose(0, 2, 1, 3).reshape(bsz, lq, d)
    return o @ p["attn_out_w"].T + p["attn_out_b"]


def mamba_mixer_reference(x, c, blocks_params, num_heads):
    mask_add = local_attention_mask_additive(x.shape[1], c.shape[1])
    for p in blocks_params:
        xn = _ln_ref(x, p["seq_gamma"], p["seq_beta"])
        score = _mha_ref(xn, c, p, mask_add, num_heads)
        x2 = jnp.concatenate([xn, score], axis=-1) @ p["cross_w"].T + p["cross_b"]
        x2n = _ln_ref(x2, p["chan_gamma"], p["chan_beta"])
        h = x2n @ p["mlp_w1"].T + p["mlp_b1"]
        h = 0.5 * h * (1.0 + jax.scipy.special.erf(h / jnp.sqrt(2.0)))
        x = h @ p["mlp_w2"].T + p["mlp_b2"] + x2n
    return x


# ----------------------------------------------------------------------------
# demo
# ----------------------------------------------------------------------------
def init_block_params(key, dim):
    ks = jax.random.split(key, 14)
    bd = 1.0 / math.sqrt(dim)
    b2d = 1.0 / math.sqrt(2 * dim)
    u = lambda k, shape, bound: jax.random.uniform(k, shape, jnp.float32, -bound, bound)
    return {
        "seq_gamma": 1.0 + 0.1 * jax.random.normal(ks[0], (dim,), jnp.float32),
        "seq_beta": 0.1 * jax.random.normal(ks[1], (dim,), jnp.float32),
        "attn_in_w": u(ks[2], (3 * dim, dim), bd),
        "attn_in_b": u(ks[3], (3 * dim,), bd),
        "attn_out_w": u(ks[4], (dim, dim), bd),
        "attn_out_b": u(ks[5], (dim,), bd),
        "cross_w": u(ks[6], (dim, 2 * dim), b2d),
        "cross_b": u(ks[7], (dim,), b2d),
        "chan_gamma": 1.0 + 0.1 * jax.random.normal(ks[8], (dim,), jnp.float32),
        "chan_beta": 0.1 * jax.random.normal(ks[9], (dim,), jnp.float32),
        "mlp_w1": u(ks[10], (dim, dim), bd),
        "mlp_b1": u(ks[11], (dim,), bd),
        "mlp_w2": u(ks[12], (dim, dim), bd),
        "mlp_b2": u(ks[13], (dim,), bd),
    }


if __name__ == "__main__":
    batch, seq_q, seq_k, dim, num_heads, num_blocks = 2, 16, 32, 128, 16, 2

    key = jax.random.PRNGKey(0)
    kx, kc, kp = jax.random.split(key, 3)
    x = jax.random.normal(kx, (batch, seq_q, dim), jnp.float32)
    c = jax.random.normal(kc, (batch, seq_k, dim), jnp.float32)
    blocks_params = [init_block_params(k, dim) for k in jax.random.split(kp, num_blocks)]

    out = mamba_mixer_forward(x, c, blocks_params, num_heads)
    out = jax.block_until_ready(out)

    with jax.default_matmul_precision("float32"):
        ref = mamba_mixer_reference(x, c, blocks_params, num_heads)

    assert out.shape == (batch, seq_q, dim)
    assert bool(jnp.isfinite(out).all())
    max_err = float(jnp.max(jnp.abs(out - ref)))
    # tolerance absorbs TPU default matmul precision differences (bf16 passes)
    assert max_err < 5e-2, max_err

    print("KERNEL_OK")
</pallas_src>

<mosaic_0001>
module attributes {stable_mosaic.version = 11 : i64} {
  func.func @_layernorm_kernel(%arg0: i32, %arg1: memref<32x128xf32, #tpu.memory_space<vmem>>, %arg2: memref<1x128xf32, #tpu.memory_space<vmem>>, %arg3: memref<1x128xf32, #tpu.memory_space<vmem>>, %arg4: memref<32x128xf32, #tpu.memory_space<vmem>>) attributes {dimension_semantics = [#tpu.dimension_semantics<parallel>], iteration_bounds = array<i64: 1>, scalar_prefetch = 0 : i64, scratch_operands = 0 : i64, tpu.core_type = #tpu.core_type<tc>, window_params = [{transform_indices = @transform_0, window_bounds = array<i64: 32, 128>}, {pipeline_mode = #tpu.pipeline_mode<synchronous>, transform_indices = @transform_1, window_bounds = array<i64: 1, 128>}, {pipeline_mode = #tpu.pipeline_mode<synchronous>, transform_indices = @transform_2, window_bounds = array<i64: 1, 128>}, {transform_indices = @transform_3, window_bounds = array<i64: 32, 128>}]} {
    %c0 = arith.constant 0 : index
    %c0_0 = arith.constant 0 : index
    %0 = vector.load %arg1[%c0, %c0_0] : memref<32x128xf32, #tpu.memory_space<vmem>>, vector<32x128xf32>
    %cst = arith.constant dense<0.000000e+00> : vector<32xf32>
    %1 = vector.multi_reduction <add>, %0, %cst [1] : vector<32x128xf32> to vector<32xf32>
    %2 = vector.shape_cast %1 : vector<32xf32> to vector<32x1xf32>
    %cst_1 = arith.constant 1.280000e+02 : f32
    %3 = vector.broadcast %cst_1 : f32 to vector<32x1xf32>
    %4 = arith.divf %2, %3 : vector<32x1xf32>
    %5 = vector.broadcast %4 : vector<32x1xf32> to vector<32x128xf32>
    %6 = arith.subf %0, %5 : vector<32x128xf32>
    %7 = arith.mulf %6, %6 : vector<32x128xf32>
    %cst_2 = arith.constant dense<0.000000e+00> : vector<32xf32>
    %8 = vector.multi_reduction <add>, %7, %cst_2 [1] : vector<32x128xf32> to vector<32xf32>
    %9 = vector.shape_cast %8 : vector<32xf32> to vector<32x1xf32>
    %cst_3 = arith.constant 1.280000e+02 : f32
    %10 = vector.broadcast %cst_3 : f32 to vector<32x1xf32>
    %11 = arith.divf %9, %10 : vector<32x1xf32>
    %cst_4 = arith.constant 9.99999974E-6 : f32
    %12 = vector.broadcast %cst_4 : f32 to vector<32x1xf32>
    %13 = arith.addf %11, %12 : vector<32x1xf32>
    %14 = math.rsqrt %13 : vector<32x1xf32>
    %15 = vector.broadcast %14 : vector<32x1xf32> to vector<32x128xf32>
    %16 = arith.mulf %6, %15 : vector<32x128xf32>
    %c0_5 = arith.constant 0 : index
    %c0_6 = arith.constant 0 : index
    %17 = vector.load %arg2[%c0_5, %c0_6] : memref<1x128xf32, #tpu.memory_space<vmem>>, vector<1x128xf32>
    %18 = vector.broadcast %17 : vector<1x128xf32> to vector<32x128xf32>
    %19 = arith.mulf %16, %18 : vector<32x128xf32>
    %c0_7 = arith.constant 0 : index
    %c0_8 = arith.constant 0 : index
    %20 = vector.load %arg3[%c0_7, %c0_8] : memref<1x128xf32, #tpu.memory_space<vmem>>, vector<1x128xf32>
    %21 = vector.broadcast %20 : vector<1x128xf32> to vector<32x128xf32>
    %22 = arith.addf %19, %21 : vector<32x128xf32>
    %c0_9 = arith.constant 0 : index
    %c0_10 = arith.constant 0 : index
    %23 = vector.load %arg4[%c0_9, %c0_10] : memref<32x128xf32, #tpu.memory_space<vmem>>, vector<32x128xf32>
    tpu.vector_store %arg4[%c0_9, %c0_10], %22 {strides = array<i32>} : memref<32x128xf32, #tpu.memory_space<vmem>>, vector<32x128xf32>,
    return
  }
  func.func @transform_0(%arg0: i32) -> (i32, i32) {
    %c0_i32 = arith.constant 0 : i32
    %c0_i32_0 = arith.constant 0 : i32
    return %arg0, %c0_i32 : i32, i32
  }
  func.func @transform_1(%arg0: i32) -> (i32, i32) {
    %c0_i32 = arith.constant 0 : i32
    %c0_i32_0 = arith.constant 0 : i32
    %c0_i32_1 = arith.constant 0 : i32
    return %c0_i32, %c0_i32_0 : i32, i32
  }
  func.func @transform_2(%arg0: i32) -> (i32, i32) {
    %c0_i32 = arith.constant 0 : i32
    %c0_i32_0 = arith.constant 0 : i32
    %c0_i32_1 = arith.constant 0 : i32
    return %c0_i32, %c0_i32_0 : i32, i32
  }
  func.func @transform_3(%arg0: i32) -> (i32, i32) {
    %c0_i32 = arith.constant 0 : i32
    %c0_i32_0 = arith.constant 0 : i32
    return %arg0, %c0_i32 : i32, i32
  }
}

</mosaic_0001>

<bundles_post_ra>
// kernel: tpu_custom_call.1
= control target key start
LH: loop header
LB: loop body
LE: loop exit
PB: predicated region body
PF: predicated region fallthrough
CT: control target
= control target key end

     0   :  { %8 = vsyncpa [#allocation3], 0  ;;  %s326_s0 = inlined_call_operand.hbm [shape: f32[32,128], index: 0, kind: input, shape index: {}]   ;;  %s327_s1 = inlined_call_operand.hbm [shape: f32[1,128], index: 1, kind: input, shape index: {}]   ;;  %s328_s2 = inlined_call_operand.vmem [shape: f32[1,128], index: 2, kind: input, shape index: {}]   ;;  %s329_s3 = inlined_call_operand.hbm [shape: f32[32,128], index: 3, kind: output, shape index: {}]  }
   0x1   :  { %9 = vsyncpa [#allocation6], 0 }
   0x2   :  { %10 = vsyncpa [#allocation4], 0  ;;  %s15_s14 = sshll.u32 %s326_s0, 4  ;;  %s272_s15 = smov [#allocation2]   ;;  %s16_s14 = int_to_ptr.hbm [resolvable:$true] %s15_s14 }
   0x3   :  { %s17_s16 = sshll.u32 %s272_s15, 4  ;;  %s29_s19 = sshll.u32 %s327_s1, 4  ;;  %s18_s16 = int_to_ptr.vmem [resolvable:$true] %s17_s16  ;;  %s30_s19 = int_to_ptr.hbm [resolvable:$true] %s29_s19 }
   0x4   :  { %s273_s20 = smov 128   ;;  %s274_s21 = smov 8  }
   0x5   :  { %23 = dma.hbm_to_vmem [thread:$0]  %s16_s14, 512, %s18_s16, [#allocation3], %s273_s20, %s273_s20, %s274_s21  }
   0x6   :  { %s275_s22 = smov [#allocation5]  }
   0x7   :  { %s31_s23 = sshll.u32 %s275_s22, 4  ;;  %s32_s23 = int_to_ptr.vmem [resolvable:$true] %s31_s23 }
   0x8   :  { %34 = dma.hbm_to_vmem [thread:$0]  %s30_s19, 16, %s32_s23, [#allocation6]  }
   0x9   :  { %266 = dma.done.wait [#allocation3], 512  }
   0xa   :  { %267 = vsyncadd [#allocation3], 4294966784 }
   0xb   :  { %268 = dma.done.wait [#allocation6], 16  }
   0xc   :  { %269 = vsyncadd [#allocation6], 4294967280  ;;  %v47_v0 = vld [vmem:[#allocation2 + $0x10] sm:$0xff]  ;;  %v45_v1 = vld [vmem:[#allocation2] sm:$0xff]  ;;  %v276_v4 = vmov 128.0   ;;  %s162_s27 = sshll.u32 %s329_s3, 4  ;;  %s163_s27 = int_to_ptr.hbm [resolvable:$true] %s162_s27 }
   0xd   :  { %53 = vadd.xlane.f32.xlu1 %v47_v0  ;;  %49 = vadd.xlane.f32.xlu0 %v45_v1  ;;  %v48_v2 = vld [vmem:[#allocation2 + $0x18] sm:$0xff]  ;;  %v46_v3 = vld [vmem:[#allocation2 + $0x8] sm:$0xff]  ;;  %184 = vrcp.f32 %v276_v4  ;;  %v182_v53 = vld [vmem:[#allocation5] ss:$0 sm:$0xff] }
   0xe   :  { %v183_v61 = vld [vmem:[%s328_s2] ss:$0 sm:$0xff]  ;;  %s277_s2 = smov [#allocation7]  }
   0xf   :  { %s160_s24 = sshll.u32 %s277_s2, 4  ;;  %s161_s24 = int_to_ptr.vmem [resolvable:$true] %s160_s24 }
  0x13   :  { %v185_v5 = vpop.eup %184 }
  0x14   :  { %v58_v6 = vmul.f32 128.0, %v185_v5  ;;  %vm62_vm0 = vweird.f32 %v185_v5 }
  0x15   :  { %55 = vadd.xlane.f32.xlu1 %v48_v2  ;;  %51 = vadd.xlane.f32.xlu0 %v46_v3 }
  0x16   :  { %v59_v7 = vsub.f32 1.0, %v58_v6 }
  0x18   :  { %v60_v8 = vmul.f32 %v185_v5, %v59_v7 }
  0x1a   :  { %v61_v9 = vadd.f32 %v185_v5, %v60_v8 }
  0x1c   :  { %v63_v10 = vsel %vm62_vm0, %v185_v5, %v61_v9 }
  0x80   :  { %v54_v11 = vpop.xlane.xlu1 %53  ;;  %v50_v12 = vpop.xlane.xlu0 %49 }
  0x81   :  { %v66_v13 = vmul.f32 %v63_v10, %v54_v11  ;;  %v64_v14 = vmul.f32 %v63_v10, %v50_v12 }
  0x83   :  { %v70_v15 = vsub.f32 %v47_v0, %v66_v13  ;;  %v68_v16 = vsub.f32 %v45_v1, %v64_v14 }
  0x85   :  { %v74_v17 = vmul.f32 %v70_v15, %v70_v15  ;;  %v72_v18 = vmul.f32 %v68_v16, %v68_v16 }
  0x87   :  { %80 = vadd.xlane.f32.xlu0 %v74_v17  ;;  %76 = vadd.xlane.f32.xlu2 %v72_v18 }
  0x88   :  { %v56_v19 = vpop.xlane.xlu1 %55  ;;  %v52_v20 = vpop.xlane.xlu0 %51 }
  0x89   :  { %v67_v21 = vmul.f32 %v63_v10, %v56_v19  ;;  %v65_v22 = vmul.f32 %v63_v10, %v52_v20 }
  0x8b   :  { %v307_v23 = vsub.f32 %v48_v2, %v67_v21  ;;  %v309_v24 = vsub.f32 %v46_v3, %v65_v22 }
  0x8d   :  { %v75_v25 = vmul.f32 %v307_v23, %v307_v23  ;;  %v73_v26 = vmul.f32 %v309_v24, %v309_v24 }
  0x8f   :  { %82 = vadd.xlane.f32.xlu1 %v75_v25  ;;  %78 = vadd.xlane.f32.xlu2 %v73_v26 }
  0xfa   :  { %v77_v27 = vpop.xlane.xlu2 %76  ;;  %v81_v28 = vpop.xlane.xlu0 %80 }
  0xfb   :  { %v84_v29 = vmul.f32 %v77_v27, %v63_v10  ;;  %v86_v30 = vmul.f32 %v81_v28, %v63_v10 }
  0xfd   :  { %v88_v31 = vadd.f32 1e-05, %v84_v29  ;;  %v90_v32 = vadd.f32 1e-05, %v86_v30 }
  0xff   :  { %186 = vrsqrt.f32 %v88_v31  ;;  %vm98_vm3 = vweird.f32 %v88_v31  ;;  %vm118_vm5 = vweird.f32 %v90_v32 }
 0x100   :  { %188 = vrsqrt.f32 %v90_v32 }
 0x102   :  { %v83_v33 = vpop.xlane.xlu1 %82  ;;  %v79_v34 = vpop.xlane.xlu2 %78 }
 0x103   :  { %v87_v35 = vmul.f32 %v83_v33, %v63_v10  ;;  %v85_v36 = vmul.f32 %v79_v34, %v63_v10 }
 0x105   :  { %v187_v37 = vpop.eup %186  ;;  %v91_v38 = vadd.f32 1e-05, %v87_v35  ;;  %v89_v39 = vadd.f32 1e-05, %v85_v36 }
 0x106   :  { %v189_v40 = vpop.eup %188  ;;  %v93_v41 = vmul.f32 %v187_v37, %v88_v31  ;;  %vm99_vm1 = vweird.f32 %v187_v37 }
 0x107   :  { %v113_v42 = vmul.f32 %v189_v40, %v90_v32  ;;  %190 = vrsqrt.f32 %v91_v38  ;;  %vm119_vm2 = vweird.f32 %v189_v40  ;;  %vm100_vm4 = vmor %vm98_vm3, %vm99_vm1  ;;  %vm128_vm9 = vweird.f32 %v91_v38 }
 0x108   :  { %v94_v43 = vmul.f32 %v187_v37, %v93_v41  ;;  %192 = vrsqrt.f32 %v89_v39  ;;  %vm120_vm6 = vmor %vm118_vm5, %vm119_vm2  ;;  %vm108_vm11 = vweird.f32 %v89_v39 }
 0x109   :  { %v114_v44 = vmul.f32 %v189_v40, %v113_v42 }
 0x10a   :  { %v95_v45 = vmul.f32 0.5, %v94_v43 }
 0x10b   :  { %v115_v46 = vmul.f32 0.5, %v114_v44 }
 0x10c   :  { %v96_v47 = vsub.f32 1.5, %v95_v45 }
 0x10d   :  { %v191_v48 = vpop.eup %190  ;;  %v116_v49 = vsub.f32 1.5, %v115_v46 }
 0x10e   :  { %v193_v50 = vpop.eup %192  ;;  %v97_v51 = vmul.f32 %v187_v37, %v96_v47  ;;  %v123_v52 = vmul.f32 %v191_v48, %v91_v38  ;;  %vm129_vm7 = vweird.f32 %v191_v48 }
 0x10f   :  { %v117_v54 = vmul.f32 %v189_v40, %v116_v49  ;;  %v103_v55 = vmul.f32 %v193_v50, %v89_v39  ;;  %vm109_vm8 = vweird.f32 %v193_v50  ;;  %vm130_vm10 = vmor %vm128_vm9, %vm129_vm7 }
 0x110   :  { %v101_v56 = vsel %vm100_vm4, %v187_v37, %v97_v51  ;;  %v124_v57 = vmul.f32 %v191_v48, %v123_v52  ;;  %vm110_vm12 = vmor %vm108_vm11, %vm109_vm8 }
 0x111   :  { %v132_v58 = vmul.f32 %v101_v56, %v68_v16  ;;  %v121_v59 = vsel %vm120_vm6, %v189_v40, %v117_v54  ;;  %v104_v60 = vmul.f32 %v193_v50, %v103_v55 }
 0x112   :  { %v134_v62 = vmul.f32 %v121_v59, %v70_v15  ;;  %v125_v63 = vmul.f32 0.5, %v124_v57 }
 0x113   :  { %v140_v0 = vmul.f32 %v182_v53, %v132_v58  ;;  %v105_v1 = vmul.f32 0.5, %v104_v60 }
 0x114   :  { %v142_v2 = vmul.f32 %v182_v53, %v134_v62  ;;  %v126_v3 = vsub.f32 1.5, %v125_v63 }
 0x115   :  { %v106_v4 = vsub.f32 1.5, %v105_v1  ;;  %v148_v5 = vadd.f32 %v183_v61, %v140_v0 }
 0x116   :  { %v127_v6 = vmul.f32 %v191_v48, %v126_v3  ;;  %v150_v7 = vadd.f32 %v183_v61, %v142_v2 }
 0x117   :  { %v107_v8 = vmul.f32 %v193_v50, %v106_v4  ;;  %152 = vst [vmem:[#allocation7] sm:$0xff] %v148_v5 }
 0x118   :  { %v131_v9 = vsel %vm130_vm10, %v191_v48, %v127_v6  ;;  %154 = vst [vmem:[#allocation7 + $0x10] sm:$0xff] %v150_v7 }
 0x119   :  { %v135_v10 = vmul.f32 %v131_v9, %v307_v23  ;;  %v111_v11 = vsel %vm110_vm12, %v193_v50, %v107_v8 }
 0x11a   :  { %v133_v12 = vmul.f32 %v111_v11, %v309_v24 }
 0x11b   :  { %v143_v13 = vmul.f32 %v182_v53, %v135_v10 }
 0x11c   :  { %v141_v14 = vmul.f32 %v182_v53, %v133_v12 }
 0x11d   :  { %v151_v15 = vadd.f32 %v183_v61, %v143_v13 }
 0x11e   :  { %v149_v16 = vadd.f32 %v183_v61, %v141_v14 }
 0x11f   :  { %155 = vst [vmem:[#allocation7 + $0x18] sm:$0xff] %v151_v15 }
 0x120   :  { %153 = vst [vmem:[#allocation7 + $0x8] sm:$0xff] %v149_v16 }
 0x121   :  { %168 = dma.vmem_to_hbm [thread:$0]  %s161_s24, 512, %s163_s27, [#allocation4], %s273_s20, %s273_s20, %s274_s21  }
 0x122   :  { %270 = dma.done.wait [#allocation4], 512  }
 0x123   :  { %271 = vsyncadd [#allocation4], 4294966784 }
 0x124   :  { %173 = vsyncpa [#allocation3], 1 }
 0x125   :  { %174 = vsyncpa [#allocation6], 1 }
 0x126   :  { %175 = vsyncpa [#allocation4], 1 }

</bundles_post_ra>
